<compile_context>
chip_gen: v6e
topology: v6e:2x2x1
jax: 0.10.0
libtpu: 0.0.40
codegen_flags: <defaults>
</compile_context>

<pallas_src>
import functools
import math

import jax
import jax.numpy as jnp
from jax.experimental import pallas as pl
from jax.experimental.pallas import tpu as pltpu


def _round_up(x, m):
    return ((x + m - 1) // m) * m


def _choose_t_tile(T, C, itemsize, t_tile=None):
    """Pick the time-tile length (multiple of 128 dividing T, VMEM-budgeted)."""
    if t_tile is not None:
        assert T % t_tile == 0 and (t_tile == T or t_tile % 128 == 0)
        return t_tile
    budget = 6 * 1024 * 1024  # 3 inputs x 2 pipeline buffers comfortably < 16 MiB
    for cand in (1024, 512, 256, 128):
        if T % cand == 0 and 3 * 2 * C * cand * itemsize <= budget:
            return cand
    return T  # single tile (short utterances / ragged T)


def _decoder_kernel(s1_ref, w1_ref, s2_ref, w2_ref, s3_ref, w3_ref,
                    o1_ref, o2_ref, o3_ref, y_ref, *,
                    s_align, t_tile, t_pad, n_chunks):
    """One (batch, time-tile) step of all three transposed convolutions.

    s*_ref : (1, C, Tt)     input tile, NCT (no host transpose needed)
    w*_ref : (R*Sa, C)      weight, host-rearranged: row j*Sa + r == w[:, j*S + r]
    o*_ref : (1, Sa, Ttp)   per-tile partial output, frames on lanes (dense)
    y_ref  : (maxR*Sa, Ttp) VMEM scratch holding the zero-padded matmul result
    """
    Sa, Tt, Ttp = s_align, t_tile, t_pad

    # Lanes [Tt, Ttp) must read as zero below (they are the halo / roll-wrap
    # region).  Scratch persists across grid steps, so zero it every step.
    y_ref[...] = jnp.zeros(y_ref.shape, jnp.float32)

    def one(s_ref, w_ref, o_ref, n_chunk):
        rows = n_chunk * Sa
        # Hot path: (R*Sa, C) @ (C, Tt) on the MXU, f32 accumulation.
        y = jnp.dot(w_ref[...], s_ref[0], preferred_element_type=jnp.float32)
        y_ref[0:rows, 0:Tt] = y

        # Overlap-add with the frame shift on the lane axis:
        #   acc[r, i] = sum_j y[j*Sa + r, i - j]    (XLU roll + aligned adds)
        acc = jnp.zeros((Sa, Ttp), jnp.float32)
        for j in range(n_chunk):           # n_chunk = L/stride is small: unroll
            slab = y_ref[j * Sa:(j + 1) * Sa, :]        # 8-aligned sublane slice
            if j:
                # Wrapped lanes [Ttp - j, Ttp) are zeros by construction.
                slab = pltpu.roll(slab, shift=j, axis=1)
            acc = acc + slab
        o_ref[0] = acc.astype(o_ref.dtype)

    one(s1_ref, w1_ref, o1_ref, n_chunks[0])
    one(s2_ref, w2_ref, o2_ref, n_chunks[1])
    one(s3_ref, w3_ref, o3_ref, n_chunks[2])


def speech_decoder_forward(s1, s2, s3, w1, b1, w2, b2, w3, b3, *,
                           stride, t_tile=None):
    """Fused Pallas SpeechDecoder.forward.

    s1, s2, s3 : (B, C, T) inputs (PyTorch NCT layout).
    w*         : (C, L*) ConvTranspose1d weights (out_channels=1 squeezed).
    b*         : (1,) biases.
    Returns three (B, 1, (T-1)*stride + L*) arrays, matching nn.ConvTranspose1d.
    """
    B, C, T = s1.shape
    assert s2.shape == (B, C, T) and s3.shape == (B, C, T)
    S = stride
    Sa = _round_up(S, 8)                      # sublane-aligned phase count

    def prep_w(w):
        L = w.shape[1]
        Lp = _round_up(L, S)                  # extra zero taps contribute nothing
        R = Lp // S
        wp = jnp.pad(w, ((0, 0), (0, Lp - L)))                      # (C, Lp)
        # (C, R, S) -> (R, S, C) -> pad S->Sa -> (R*Sa, C).  Tiny one-off
        # rearrangement of the weights only (activations are untouched).
        wr = jnp.transpose(wp.reshape(C, R, S), (1, 2, 0))
        wr = jnp.pad(wr, ((0, 0), (0, Sa - S), (0, 0)))
        return wr.reshape(R * Sa, C), L, R

    w1a, L1, R1 = prep_w(w1)
    w2a, L2, R2 = prep_w(w2)
    w3a, L3, R3 = prep_w(w3)
    max_R = max(R1, R2, R3)
    assert max_R <= 128, "kernel_size/stride ratio exceeds one lane tile"

    Tt = _choose_t_tile(T, C, s1.dtype.itemsize, t_tile)
    K = T // Tt
    Ttp = _round_up(Tt + max_R - 1, 128)      # lane-dense per-tile output width
    Hw = Ttp - Tt                             # halo lanes spilling into tile k+1

    kernel = functools.partial(
        _decoder_kernel, s_align=Sa, t_tile=Tt, t_pad=Ttp,
        n_chunks=(R1, R2, R3))

    s_spec = pl.BlockSpec((1, C, Tt), lambda b, k: (b, 0, k))
    o_spec = pl.BlockSpec((1, Sa, Ttp), lambda b, k: (b, 0, k))

    def w_spec(wa):
        return pl.BlockSpec(wa.shape, lambda b, k: (0, 0))

    flops = 2 * B * T * C * (R1 + R2 + R3) * Sa
    bytes_accessed = ((s1.size + s2.size + s3.size) * s1.dtype.itemsize
                      + (w1a.size + w2a.size + w3a.size) * w1a.dtype.itemsize
                      + 3 * B * Sa * K * Ttp * 4)

    p1, p2, p3 = pl.pallas_call(
        kernel,
        out_shape=tuple(jax.ShapeDtypeStruct((B, Sa, K * Ttp), jnp.float32)
                        for _ in range(3)),
        grid=(B, K),
        in_specs=[s_spec, w_spec(w1a), s_spec, w_spec(w2a), s_spec, w_spec(w3a)],
        out_specs=[o_spec, o_spec, o_spec],
        scratch_shapes=[pltpu.VMEM((max_R * Sa, Ttp), jnp.float32)],
        compiler_params=pltpu.CompilerParams(
            dimension_semantics=("parallel", "parallel")),
        cost_estimate=pl.CostEstimate(flops=flops, transcendentals=0,
                                      bytes_accessed=bytes_accessed),
    )(s1, w1a, s2, w2a, s3, w3a)

    def finish(partial, L, bias):
        # Combine per-tile halos, transpose frames back to flat audio order,
        # add the bias and drop the padding tail (output is tiny vs. input).
        p = partial.reshape(B, Sa, K, Ttp)
        frames = jnp.zeros((B, Sa, K * Tt + Hw), jnp.float32)
        frames = frames.at[:, :, :K * Tt].set(
            p[:, :, :, :Tt].reshape(B, Sa, K * Tt))
        for k in range(K):
            frames = frames.at[:, :, (k + 1) * Tt:(k + 1) * Tt + Hw].add(
                p[:, :, k, Tt:])
        out_len = (T - 1) * S + L
        flat = jnp.transpose(frames[:, :S, :], (0, 2, 1)).reshape(B, -1)
        return (flat[:, :out_len] + bias[0]).astype(s1.dtype)[:, None, :]

    return finish(p1, L1, b1), finish(p2, L2, b2), finish(p3, L3, b3)


class SpeechDecoderPallas:
    """Mirror of SpEx+ SpeechDecoder.forward using a fused Pallas kernel."""

    def __init__(self, key, *, speech_encoder_out_channels, L1, L2, L3):
        C = speech_encoder_out_channels
        self.stride = L1 // 2
        ks = jax.random.split(key, 6)

        def init_w(k, L):
            bound = 1.0 / math.sqrt(C * L)
            return jax.random.uniform(k, (C, L), jnp.float32, -bound, bound)

        def init_b(k, L):
            bound = 1.0 / math.sqrt(C * L)
            return jax.random.uniform(k, (1,), jnp.float32, -bound, bound)

        self.w1, self.b1 = init_w(ks[0], L1), init_b(ks[1], L1)
        self.w2, self.b2 = init_w(ks[2], L2), init_b(ks[3], L2)
        self.w3, self.b3 = init_w(ks[4], L3), init_b(ks[5], L3)

    def __call__(self, s1, s2, s3, *, t_tile=None):
        return speech_decoder_forward(
            s1, s2, s3,
            self.w1, self.b1, self.w2, self.b2, self.w3, self.b3,
            stride=self.stride, t_tile=t_tile)


def _ref_conv_transpose1d(s, w, b, stride):
    """Pure-JAX reference matching nn.ConvTranspose1d(C, 1, L, stride)."""
    B, C, T = s.shape
    L = w.shape[1]
    out_len = (T - 1) * stride + L
    y = jnp.einsum("bct,cl->btl", s, w)                 # (B, T, L)
    out = jnp.zeros((B, out_len), jnp.float32)
    for l in range(L):
        out = out.at[:, l:l + (T - 1) * stride + 1:stride].add(y[:, :, l])
    return (out + b[0])[:, None, :]


if __name__ == "__main__":
    key = jax.random.PRNGKey(0)
    k_params, k1, k2, k3 = jax.random.split(key, 4)

    B, C = 2, 16
    L1, L2, L3 = 8, 16, 32          # stride = L1 // 2 = 4
    decoder = SpeechDecoderPallas(
        k_params, speech_encoder_out_channels=C, L1=L1, L2=L2, L3=L3)

    def check(T):
        s1 = jax.random.normal(k1, (B, C, T), jnp.float32)
        s2 = jax.random.normal(k2, (B, C, T), jnp.float32)
        s3 = jax.random.normal(k3, (B, C, T), jnp.float32)
        o1, o2, o3 = decoder(s1, s2, s3)
        jax.block_until_ready((o1, o2, o3))

        r1 = _ref_conv_transpose1d(s1, decoder.w1, decoder.b1, decoder.stride)
        r2 = _ref_conv_transpose1d(s2, decoder.w2, decoder.b2, decoder.stride)
        r3 = _ref_conv_transpose1d(s3, decoder.w3, decoder.b3, decoder.stride)

        assert o1.shape == (B, 1, (T - 1) * decoder.stride + L1)
        assert o2.shape == (B, 1, (T - 1) * decoder.stride + L2)
        assert o3.shape == (B, 1, (T - 1) * decoder.stride + L3)
        assert jnp.allclose(o1, r1, rtol=1e-4, atol=1e-4)
        assert jnp.allclose(o2, r2, rtol=1e-4, atol=1e-4)
        assert jnp.allclose(o3, r3, rtol=1e-4, atol=1e-4)

    check(T=8)      # tiny, single time tile (K = 1)
    check(T=384)    # multi-tile path (K = 3) exercising the halo combine

    print("KERNEL_OK")
</pallas_src>

<mosaic_0001>
module attributes {stable_mosaic.version = 11 : i64} {
  func.func @_decoder_kernel(%arg0: i32, %arg1: i32, %arg2: memref<1x16x8xf32, #tpu.memory_space<vmem>>, %arg3: memref<16x16xf32, #tpu.memory_space<vmem>>, %arg4: memref<1x16x8xf32, #tpu.memory_space<vmem>>, %arg5: memref<32x16xf32, #tpu.memory_space<vmem>>, %arg6: memref<1x16x8xf32, #tpu.memory_space<vmem>>, %arg7: memref<64x16xf32, #tpu.memory_space<vmem>>, %arg8: memref<1x8x128xf32, #tpu.memory_space<vmem>>, %arg9: memref<1x8x128xf32, #tpu.memory_space<vmem>>, %arg10: memref<1x8x128xf32, #tpu.memory_space<vmem>>, %arg11: memref<64x128xf32, #tpu.memory_space<vmem>>) attributes {dimension_semantics = [#tpu.dimension_semantics<parallel>, #tpu.dimension_semantics<parallel>], iteration_bounds = array<i64: 2, 1>, scalar_prefetch = 0 : i64, scratch_operands = 1 : i64, tpu.core_type = #tpu.core_type<tc>, window_params = [{transform_indices = @transform_0, window_bounds = array<i64: 1, 16, 8>}, {pipeline_mode = #tpu.pipeline_mode<synchronous>, transform_indices = @transform_1, window_bounds = array<i64: 16, 16>}, {transform_indices = @transform_2, window_bounds = array<i64: 1, 16, 8>}, {pipeline_mode = #tpu.pipeline_mode<synchronous>, transform_indices = @transform_3, window_bounds = array<i64: 32, 16>}, {transform_indices = @transform_4, window_bounds = array<i64: 1, 16, 8>}, {pipeline_mode = #tpu.pipeline_mode<synchronous>, transform_indices = @transform_5, window_bounds = array<i64: 64, 16>}, {transform_indices = @transform_6, window_bounds = array<i64: 1, 8, 128>}, {transform_indices = @transform_7, window_bounds = array<i64: 1, 8, 128>}, {transform_indices = @transform_8, window_bounds = array<i64: 1, 8, 128>}]} {
    %cst = arith.constant 0.000000e+00 : f32
    %0 = vector.broadcast %cst : f32 to vector<64x128xf32>
    %c0 = arith.constant 0 : index
    %c0_0 = arith.constant 0 : index
    %1 = vector.load %arg11[%c0, %c0_0] : memref<64x128xf32, #tpu.memory_space<vmem>>, vector<64x128xf32>
    tpu.vector_store %arg11[%c0, %c0_0], %0 {strides = array<i32>} : memref<64x128xf32, #tpu.memory_space<vmem>>, vector<64x128xf32>,
    %c0_1 = arith.constant 0 : index
    %c0_2 = arith.constant 0 : index
    %2 = vector.load %arg3[%c0_1, %c0_2] : memref<16x16xf32, #tpu.memory_space<vmem>>, vector<16x16xf32>
    %c0_3 = arith.constant 0 : index
    %c0_4 = arith.constant 0 : index
    %c0_5 = arith.constant 0 : index
    %3 = vector.load %arg2[%c0_3, %c0_4, %c0_5] : memref<1x16x8xf32, #tpu.memory_space<vmem>>, vector<1x16x8xf32>
    %4 = vector.shape_cast %3 : vector<1x16x8xf32> to vector<16x8xf32>
    %cst_6 = arith.constant dense<0.000000e+00> : vector<16x8xf32>
    %5 = tpu.matmul %2, %4, %cst_6 {dimension_numbers = #tpu.dot_dimension_numbers<[1], [0], [0], [1], [0, 0, 1, 1], [], []>} : vector<16x16xf32>, vector<16x8xf32>, vector<16x8xf32> -> vector<16x8xf32>
    %c0_7 = arith.constant 0 : index
    %c0_8 = arith.constant 0 : index
    %6 = vector.load %arg11[%c0_7, %c0_8] : memref<64x128xf32, #tpu.memory_space<vmem>>, vector<16x8xf32>
    tpu.vector_store %arg11[%c0_7, %c0_8], %5 {strides = array<i32>} : memref<64x128xf32, #tpu.memory_space<vmem>>, vector<16x8xf32>,
    %cst_9 = arith.constant 0.000000e+00 : f32
    %7 = vector.broadcast %cst_9 : f32 to vector<8x128xf32>
    %c0_10 = arith.constant 0 : index
    %c0_11 = arith.constant 0 : index
    %8 = vector.load %arg11[%c0_10, %c0_11] : memref<64x128xf32, #tpu.memory_space<vmem>>, vector<8x128xf32>
    %9 = arith.addf %7, %8 : vector<8x128xf32>
    %c8 = arith.constant 8 : index
    %c0_12 = arith.constant 0 : index
    %10 = vector.load %arg11[%c8, %c0_12] : memref<64x128xf32, #tpu.memory_space<vmem>>, vector<8x128xf32>
    %c1_i32 = arith.constant 1 : i32
    %11 = tpu.dynamic_rotate %10 by %c1_i32 dim 1 : vector<8x128xf32>, i32 -> vector<8x128xf32>
    %12 = arith.addf %9, %11 : vector<8x128xf32>
    %c0_13 = arith.constant 0 : index
    %c0_14 = arith.constant 0 : index
    %c0_15 = arith.constant 0 : index
    %13 = vector.load %arg8[%c0_13, %c0_14, %c0_15] : memref<1x8x128xf32, #tpu.memory_space<vmem>>, vector<1x8x128xf32>
    %14 = vector.shape_cast %13 : vector<1x8x128xf32> to vector<8x128xf32>
    %15 = vector.shape_cast %12 : vector<8x128xf32> to vector<1x8x128xf32>
    tpu.vector_store %arg8[%c0_13, %c0_14, %c0_15], %15 {strides = array<i32>} : memref<1x8x128xf32, #tpu.memory_space<vmem>>, vector<1x8x128xf32>,
    %c0_16 = arith.constant 0 : index
    %c0_17 = arith.constant 0 : index
    %16 = vector.load %arg5[%c0_16, %c0_17] : memref<32x16xf32, #tpu.memory_space<vmem>>, vector<32x16xf32>
    %c0_18 = arith.constant 0 : index
    %c0_19 = arith.constant 0 : index
    %c0_20 = arith.constant 0 : index
    %17 = vector.load %arg4[%c0_18, %c0_19, %c0_20] : memref<1x16x8xf32, #tpu.memory_space<vmem>>, vector<1x16x8xf32>
    %18 = vector.shape_cast %17 : vector<1x16x8xf32> to vector<16x8xf32>
    %cst_21 = arith.constant dense<0.000000e+00> : vector<32x8xf32>
    %19 = tpu.matmul %16, %18, %cst_21 {dimension_numbers = #tpu.dot_dimension_numbers<[1], [0], [0], [1], [0, 0, 1, 1], [], []>} : vector<32x16xf32>, vector<16x8xf32>, vector<32x8xf32> -> vector<32x8xf32>
    %c0_22 = arith.constant 0 : index
    %c0_23 = arith.constant 0 : index
    %20 = vector.load %arg11[%c0_22, %c0_23] : memref<64x128xf32, #tpu.memory_space<vmem>>, vector<32x8xf32>
    tpu.vector_store %arg11[%c0_22, %c0_23], %19 {strides = array<i32>} : memref<64x128xf32, #tpu.memory_space<vmem>>, vector<32x8xf32>,
    %cst_24 = arith.constant 0.000000e+00 : f32
    %21 = vector.broadcast %cst_24 : f32 to vector<8x128xf32>
    %c0_25 = arith.constant 0 : index
    %c0_26 = arith.constant 0 : index
    %22 = vector.load %arg11[%c0_25, %c0_26] : memref<64x128xf32, #tpu.memory_space<vmem>>, vector<8x128xf32>
    %23 = arith.addf %21, %22 : vector<8x128xf32>
    %c8_27 = arith.constant 8 : index
    %c0_28 = arith.constant 0 : index
    %24 = vector.load %arg11[%c8_27, %c0_28] : memref<64x128xf32, #tpu.memory_space<vmem>>, vector<8x128xf32>
    %c1_i32_29 = arith.constant 1 : i32
    %25 = tpu.dynamic_rotate %24 by %c1_i32_29 dim 1 : vector<8x128xf32>, i32 -> vector<8x128xf32>
    %26 = arith.addf %23, %25 : vector<8x128xf32>
    %c16 = arith.constant 16 : index
    %c0_30 = arith.constant 0 : index
    %27 = vector.load %arg11[%c16, %c0_30] : memref<64x128xf32, #tpu.memory_space<vmem>>, vector<8x128xf32>
    %c2_i32 = arith.constant 2 : i32
    %28 = tpu.dynamic_rotate %27 by %c2_i32 dim 1 : vector<8x128xf32>, i32 -> vector<8x128xf32>
    %29 = arith.addf %26, %28 : vector<8x128xf32>
    %c24 = arith.constant 24 : index
    %c0_31 = arith.constant 0 : index
    %30 = vector.load %arg11[%c24, %c0_31] : memref<64x128xf32, #tpu.memory_space<vmem>>, vector<8x128xf32>
    %c3_i32 = arith.constant 3 : i32
    %31 = tpu.dynamic_rotate %30 by %c3_i32 dim 1 : vector<8x128xf32>, i32 -> vector<8x128xf32>
    %32 = arith.addf %29, %31 : vector<8x128xf32>
    %c0_32 = arith.constant 0 : index
    %c0_33 = arith.constant 0 : index
    %c0_34 = arith.constant 0 : index
    %33 = vector.load %arg9[%c0_32, %c0_33, %c0_34] : memref<1x8x128xf32, #tpu.memory_space<vmem>>, vector<1x8x128xf32>
    %34 = vector.shape_cast %33 : vector<1x8x128xf32> to vector<8x128xf32>
    %35 = vector.shape_cast %32 : vector<8x128xf32> to vector<1x8x128xf32>
    tpu.vector_store %arg9[%c0_32, %c0_33, %c0_34], %35 {strides = array<i32>} : memref<1x8x128xf32, #tpu.memory_space<vmem>>, vector<1x8x128xf32>,
    %c0_35 = arith.constant 0 : index
    %c0_36 = arith.constant 0 : index
    %36 = vector.load %arg7[%c0_35, %c0_36] : memref<64x16xf32, #tpu.memory_space<vmem>>, vector<64x16xf32>
    %c0_37 = arith.constant 0 : index
    %c0_38 = arith.constant 0 : index
    %c0_39 = arith.constant 0 : index
    %37 = vector.load %arg6[%c0_37, %c0_38, %c0_39] : memref<1x16x8xf32, #tpu.memory_space<vmem>>, vector<1x16x8xf32>
    %38 = vector.shape_cast %37 : vector<1x16x8xf32> to vector<16x8xf32>
    %cst_40 = arith.constant dense<0.000000e+00> : vector<64x8xf32>
    %39 = tpu.matmul %36, %38, %cst_40 {dimension_numbers = #tpu.dot_dimension_numbers<[1], [0], [0], [1], [0, 0, 1, 1], [], []>} : vector<64x16xf32>, vector<16x8xf32>, vector<64x8xf32> -> vector<64x8xf32>
    %c0_41 = arith.constant 0 : index
    %c0_42 = arith.constant 0 : index
    %40 = vector.load %arg11[%c0_41, %c0_42] : memref<64x128xf32, #tpu.memory_space<vmem>>, vector<64x8xf32>
    tpu.vector_store %arg11[%c0_41, %c0_42], %39 {strides = array<i32>} : memref<64x128xf32, #tpu.memory_space<vmem>>, vector<64x8xf32>,
    %cst_43 = arith.constant 0.000000e+00 : f32
    %41 = vector.broadcast %cst_43 : f32 to vector<8x128xf32>
    %c0_44 = arith.constant 0 : index
    %c0_45 = arith.constant 0 : index
    %42 = vector.load %arg11[%c0_44, %c0_45] : memref<64x128xf32, #tpu.memory_space<vmem>>, vector<8x128xf32>
    %43 = arith.addf %41, %42 : vector<8x128xf32>
    %c8_46 = arith.constant 8 : index
    %c0_47 = arith.constant 0 : index
    %44 = vector.load %arg11[%c8_46, %c0_47] : memref<64x128xf32, #tpu.memory_space<vmem>>, vector<8x128xf32>
    %c1_i32_48 = arith.constant 1 : i32
    %45 = tpu.dynamic_rotate %44 by %c1_i32_48 dim 1 : vector<8x128xf32>, i32 -> vector<8x128xf32>
    %46 = arith.addf %43, %45 : vector<8x128xf32>
    %c16_49 = arith.constant 16 : index
    %c0_50 = arith.constant 0 : index
    %47 = vector.load %arg11[%c16_49, %c0_50] : memref<64x128xf32, #tpu.memory_space<vmem>>, vector<8x128xf32>
    %c2_i32_51 = arith.constant 2 : i32
    %48 = tpu.dynamic_rotate %47 by %c2_i32_51 dim 1 : vector<8x128xf32>, i32 -> vector<8x128xf32>
    %49 = arith.addf %46, %48 : vector<8x128xf32>
    %c24_52 = arith.constant 24 : index
    %c0_53 = arith.constant 0 : index
    %50 = vector.load %arg11[%c24_52, %c0_53] : memref<64x128xf32, #tpu.memory_space<vmem>>, vector<8x128xf32>
    %c3_i32_54 = arith.constant 3 : i32
    %51 = tpu.dynamic_rotate %50 by %c3_i32_54 dim 1 : vector<8x128xf32>, i32 -> vector<8x128xf32>
    %52 = arith.addf %49, %51 : vector<8x128xf32>
    %c32 = arith.constant 32 : index
    %c0_55 = arith.constant 0 : index
    %53 = vector.load %arg11[%c32, %c0_55] : memref<64x128xf32, #tpu.memory_space<vmem>>, vector<8x128xf32>
    %c4_i32 = arith.constant 4 : i32
    %54 = tpu.dynamic_rotate %53 by %c4_i32 dim 1 : vector<8x128xf32>, i32 -> vector<8x128xf32>
    %55 = arith.addf %52, %54 : vector<8x128xf32>
    %c40 = arith.constant 40 : index
    %c0_56 = arith.constant 0 : index
    %56 = vector.load %arg11[%c40, %c0_56] : memref<64x128xf32, #tpu.memory_space<vmem>>, vector<8x128xf32>
    %c5_i32 = arith.constant 5 : i32
    %57 = tpu.dynamic_rotate %56 by %c5_i32 dim 1 : vector<8x128xf32>, i32 -> vector<8x128xf32>
    %58 = arith.addf %55, %57 : vector<8x128xf32>
    %c48 = arith.constant 48 : index
    %c0_57 = arith.constant 0 : index
    %59 = vector.load %arg11[%c48, %c0_57] : memref<64x128xf32, #tpu.memory_space<vmem>>, vector<8x128xf32>
    %c6_i32 = arith.constant 6 : i32
    %60 = tpu.dynamic_rotate %59 by %c6_i32 dim 1 : vector<8x128xf32>, i32 -> vector<8x128xf32>
    %61 = arith.addf %58, %60 : vector<8x128xf32>
    %c56 = arith.constant 56 : index
    %c0_58 = arith.constant 0 : index
    %62 = vector.load %arg11[%c56, %c0_58] : memref<64x128xf32, #tpu.memory_space<vmem>>, vector<8x128xf32>
    %c7_i32 = arith.constant 7 : i32
    %63 = tpu.dynamic_rotate %62 by %c7_i32 dim 1 : vector<8x128xf32>, i32 -> vector<8x128xf32>
    %64 = arith.addf %61, %63 : vector<8x128xf32>
    %c0_59 = arith.constant 0 : index
    %c0_60 = arith.constant 0 : index
    %c0_61 = arith.constant 0 : index
    %65 = vector.load %arg10[%c0_59, %c0_60, %c0_61] : memref<1x8x128xf32, #tpu.memory_space<vmem>>, vector<1x8x128xf32>
    %66 = vector.shape_cast %65 : vector<1x8x128xf32> to vector<8x128xf32>
    %67 = vector.shape_cast %64 : vector<8x128xf32> to vector<1x8x128xf32>
    tpu.vector_store %arg10[%c0_59, %c0_60, %c0_61], %67 {strides = array<i32>} : memref<1x8x128xf32, #tpu.memory_space<vmem>>, vector<1x8x128xf32>,
    return
  }
  func.func @transform_0(%arg0: i32, %arg1: i32) -> (i32, i32, i32) {
    %c0_i32 = arith.constant 0 : i32
    %c0_i32_0 = arith.constant 0 : i32
    return %arg0, %c0_i32, %arg1 : i32, i32, i32
  }
  func.func @transform_1(%arg0: i32, %arg1: i32) -> (i32, i32) {
    %c0_i32 = arith.constant 0 : i32
    %c0_i32_0 = arith.constant 0 : i32
    %c0_i32_1 = arith.constant 0 : i32
    return %c0_i32, %c0_i32_0 : i32, i32
  }
  func.func @transform_2(%arg0: i32, %arg1: i32) -> (i32, i32, i32) {
    %c0_i32 = arith.constant 0 : i32
    %c0_i32_0 = arith.constant 0 : i32
    return %arg0, %c0_i32, %arg1 : i32, i32, i32
  }
  func.func @transform_3(%arg0: i32, %arg1: i32) -> (i32, i32) {
    %c0_i32 = arith.constant 0 : i32
    %c0_i32_0 = arith.constant 0 : i32
    %c0_i32_1 = arith.constant 0 : i32
    return %c0_i32, %c0_i32_0 : i32, i32
  }
  func.func @transform_4(%arg0: i32, %arg1: i32) -> (i32, i32, i32) {
    %c0_i32 = arith.constant 0 : i32
    %c0_i32_0 = arith.constant 0 : i32
    return %arg0, %c0_i32, %arg1 : i32, i32, i32
  }
  func.func @transform_5(%arg0: i32, %arg1: i32) -> (i32, i32) {
    %c0_i32 = arith.constant 0 : i32
    %c0_i32_0 = arith.constant 0 : i32
    %c0_i32_1 = arith.constant 0 : i32
    return %c0_i32, %c0_i32_0 : i32, i32
  }
  func.func @transform_6(%arg0: i32, %arg1: i32) -> (i32, i32, i32) {
    %c0_i32 = arith.constant 0 : i32
    %c0_i32_0 = arith.constant 0 : i32
    return %arg0, %c0_i32, %arg1 : i32, i32, i32
  }
  func.func @transform_7(%arg0: i32, %arg1: i32) -> (i32, i32, i32) {
    %c0_i32 = arith.constant 0 : i32
    %c0_i32_0 = arith.constant 0 : i32
    return %arg0, %c0_i32, %arg1 : i32, i32, i32
  }
  func.func @transform_8(%arg0: i32, %arg1: i32) -> (i32, i32, i32) {
    %c0_i32 = arith.constant 0 : i32
    %c0_i32_0 = arith.constant 0 : i32
    return %arg0, %c0_i32, %arg1 : i32, i32, i32
  }
}

</mosaic_0001>

<bundles_post_ra>
// kernel: tpu_custom_call.1
= control target key start
LH: loop header
LB: loop body
LE: loop exit
PB: predicated region body
PF: predicated region fallthrough
CT: control target
= control target key end

     0   :  { %s1668_s0 = inlined_call_operand.vmem [shape: f32[2,16,8], index: 0, kind: input, shape index: {}]   ;;  %s1669_s1 = inlined_call_operand.vmem [shape: f32[16,16], index: 1, kind: input, shape index: {}]   ;;  %s1670_s2 = inlined_call_operand.vmem [shape: f32[2,16,8], index: 2, kind: input, shape index: {}]   ;;  %s1671_s3 = inlined_call_operand.vmem [shape: f32[32,16], index: 3, kind: input, shape index: {}]   ;;  %s1672_s4 = inlined_call_operand.vmem [shape: f32[2,16,8], index: 4, kind: input, shape index: {}]   ;;  %s1673_s5 = inlined_call_operand.vmem [shape: f32[64,16], index: 5, kind: input, shape index: {}]   ;;  %s1674_s6 = inlined_call_operand.hbm [shape: f32[2,8,128], index: 6, kind: output, shape index: {0}]   ;;  %s1675_s7 = inlined_call_operand.hbm [shape: f32[2,8,128], index: 7, kind: output, shape index: {1}]   ;;  %s1676_s8 = inlined_call_operand.hbm [shape: f32[2,8,128], index: 8, kind: output, shape index: {2}]  }
   0x1   :  { %1680 = sst [smem:[#allocation10_spill]] %s1668_s0 }
   0x2   :  { %1681 = sst [smem:[#allocation11_spill]] %s1669_s1 }
   0x3   :  { %1682 = sst [smem:[#allocation12_spill]] %s1670_s2 }
   0x4   :  { %1683 = sst [smem:[#allocation13_spill]] %s1671_s3 }
   0x5   :  { %14 = vsyncpa [#allocation4], 0 }
   0x6   :  { %16 = vsyncpa [#allocation4 + $0x1], 0 }
   0x7   :  { %17 = vsyncpa [#allocation6], 0 }
   0x8   :  { %19 = vsyncpa [#allocation6 + $0x1], 0  ;;  %s1398_s27 = smov 0   ;;  %s1400_s28 = smov 0  }
   0x9   :  { %s1402_s29 = smov 0   ;;  %s1404_s30 = smov 0  }
   0xa   :  { %s1406_s9 = smov 0   ;;  %s1408_s10 = smov 0  }
   0xb LB: > { %s1678_s11 = sadd.s32 4294967295, %s1340_s10   ;;  %s1677_s12 = sadd.s32 4294967294, %s1340_s10   ;;  %s1340_s10 = sphi %s1408_s10, %s25_s10   ;;  %s1336_s9 = sphi %s1406_s9, %s1697_s9   ;;  %s1332_s30 = sphi %s1404_s30, %s1696_s30   ;;  %s1328_s29 = sphi %s1402_s29, %s1695_s29   ;;  %s1324_s28 = sphi %s1400_s28, %s1694_s28   ;;  %s1320_s27 = sphi %s1398_s27, %s1693_s27  }
   0xc   : > { %s37_s13 = sadd.s32 1, %s1336_s9  ;;  %s193_s14 = sadd.s32 1, %s1328_s29 }
   0xd   : > { %p39_p0 = scmp.ge.s32.totalorder %s37_s13, 2  ;;  %p203_p1 = scmp.ne.s32.totalorder %s1328_s29, %s1324_s28 }
   0xe   : > { %p204_p2 = scmp.eq.s32.totalorder %s1678_s11, 1  ;;  %p209_p3 = scmp.ne.s32.totalorder %s1324_s28, %s1320_s27 }
   0xf   : > { %s1699_s13 = smov (%p39_p0, %s37_s13), 0  ;;  %p210_p5 = scmp.eq.s32.totalorder %s1677_s12, 1 }
  0x10   : > { %p1440_p4 = por %p204_p2, %p203_p1  ;;  %s188_s16 = ssub.s32 %s1336_s9, %s1699_s13 }
  0x11   : > { %p1047_p6 = scmp.ge.s32.totalorder %s1340_s10, 1  ;;  %p191_p7 = scmp.eq.s32.totalorder %s188_s16, 0 }
  0x12   : > { %p1449_p8 = por %p210_p5, %p209_p3  ;;  %p326_p9 = scmp.lt.s32.totalorder %s1340_s10, 3 }
  0x13   : > { %s1455_s18 = scalar_select %p191_p7, %s1328_s29, %s193_s14  }
  0x14   : > { %p327_p10 = pnand %p1047_p6, %p326_p9 }
  0x15   : > { %p389_p11 = scmp.lt.s32.totalorder (!%p327_p10), %s1332_s30, 1  ;;  %s1686_s1 = sld [smem:[#allocation11_spill]] (!%p327_p10) }
  0x16   : > { %330 = sbr.rel (%p327_p10) target bundleno = 438 (0x1b6), region = 44  ;;  %s1687_s0 = sld [smem:[#allocation10_spill]] (!%p327_p10) }
  0x17   : > { %s1688_s2 = sld [smem:[#allocation12_spill]] (!%p327_p10)  ;;  %s1343_s22 = smov (!%p327_p10), 1  }
  0x18   : > { %s1689_s3 = sld [smem:[#allocation13_spill]] (!%p327_p10)  ;;  %s1345_s25 = smov (!%p327_p10), 4  }
  0x19   : > { %s1346_s26 = smov (!%p327_p10), 3   ;;  %s1349_s16 = smov (!%p327_p10), 7  }
  0x1a   : > { %s372_s11 = sand.u32 (!%p327_p10), 1, %s1324_s28  }
  0x1b   : > { %v421_v0 = vld [vmem:[%s1686_s1] sm:$0xff]  ;;  %vm425_vm0 = vcmask 130048   ;;  %v1342_v2 = vmov 0.0   ;;  %s390_s23 = scalar_select %p389_p11, %s1332_s30, 1  ;;  %v422_v7 = vld [vmem:[%s1686_s1 + $0x8] sm:$0xff]  ;;  %v641_v12 = vld [vmem:[%s1673_s5 + $0x10] sm:$0xff] }
  0x1c   : > { %v639_v1 = vld [vmem:[%s1673_s5] sm:$0xff]  ;;  %1106 = vmatprep.mubr.msk.f32.mxu1 %vm425_vm0, %v421_v0  ;;  %414 = vst [vmem:[#allocation2 + $0x8] sm:$0xff] %v1342_v2  ;;  %413 = vst [vmem:[#allocation2] sm:$0xff] %v1342_v2  ;;  %v640_v9 = vld [vmem:[%s1673_s5 + $0x8] sm:$0xff]  ;;  %vm507_vm1 = vcmask 64512   ;;  %s1543_s19 = sshll.u32 %s372_s11, 3 }
  0x1d   : > { %1123 = vmatprep.mubr.msk.f32.mxu0 %vm425_vm0, %v639_v1  ;;  %415 = vst [vmem:[#allocation2 + $0x10] sm:$0xff] %v1342_v2  ;;  %416 = vst [vmem:[#allocation2 + $0x18] sm:$0xff] %v1342_v2  ;;  %s1079_s24 = sshll.u32 %s390_s23, 4  ;;  %v642_v14 = vld [vmem:[%s1673_s5 + $0x18] sm:$0xff]  ;;  %v643_v16 = vld [vmem:[%s1673_s5 + $0x20] sm:$0xff]  ;;  %s1344_s23 = smov 5  }
  0x1e   : > { %417 = vst [vmem:[#allocation2 + $0x20] sm:$0xff] %v1342_v2  ;;  %418 = vst [vmem:[#allocation2 + $0x28] sm:$0xff] %v1342_v2  ;;  %s396_s14 = scalar_lea.vmem %s1687_s0, %s1079_s24  ;;  %s412_s20 = scalar_lea.vmem %s1672_s4, %s1079_s24  ;;  %v517_v11 = vld [vmem:[%s1689_s3] sm:$0xff]  ;;  %v518_v13 = vld [vmem:[%s1689_s3 + $0x8] sm:$0xff] }
  0x1f   : > { %419 = vst [vmem:[#allocation2 + $0x30] sm:$0xff] %v1342_v2  ;;  %420 = vst [vmem:[#allocation2 + $0x38] sm:$0xff] %v1342_v2  ;;  %v424_v3 = vld [vmem:[%s396_s14 + $0x8] sm:$0xff]  ;;  %v423_v5 = vld [vmem:[%s396_s14] sm:$0xff]  ;;  %s404_s12 = scalar_lea.vmem %s1688_s2, %s1079_s24  ;;  %s1347_s24 = smov 2  }
  0x20   : > { %v648_v4 = vld [vmem:[%s412_s20 + $0x8] sm:$0xff]  ;;  %1102 = vmatprep.subr.mxu1 %v424_v3  ;;  %v647_v6 = vld [vmem:[%s412_s20] sm:$0xff]  ;;  %v519_v15 = vld [vmem:[%s1689_s3 + $0x10] sm:$0xff]  ;;  %s1348_s14 = smov 6   ;;  %s1546_s20 = sshll.u32 %s1332_s30, 7 }
  0x21   : > { %1119 = vmatprep.subr.mxu0 %v648_v4  ;;  %1103 = vmatpush3.msra.mxu1 %v424_v3  ;;  %v522_v8 = vld [vmem:[%s404_s12 + $0x8] sm:$0xff]  ;;  %v521_v10 = vld [vmem:[%s404_s12] sm:$0xff]  ;;  %v520_v17 = vld [vmem:[%s1689_s3 + $0x18] sm:$0xff]  ;;  %s374_s12 = scalar_lea.vmem [#allocation3], %s1543_s19  ;;  %s1350_s0 = smov [#allocation3]  }
  0x22   : > { %1120 = vmatpush3.msra.mxu0 %v648_v4  ;;  %1104 = vmatprep.subr.mxu1 %v423_v5  ;;  %v644_v18 = vld [vmem:[%s1673_s5 + $0x28] sm:$0xff]  ;;  %v645_v19 = vld [vmem:[%s1673_s5 + $0x30] sm:$0xff]  ;;  %v646_v20 = vld [vmem:[%s1673_s5 + $0x38] sm:$0xff]  ;;  %s842_s21 = sshll.u32 %s374_s12, 4  ;;  %s1212_s1 = sshll.u32 %s1350_s0, 4  ;;  %s1563_s21 = int_to_ptr.vmem [resolvable:$true] %s842_s21  ;;  %s1213_s1 = int_to_ptr.vmem [resolvable:$false] %s1212_s1 }
  0x23   : > { %1121 = vmatprep.subr.mxu0 %v647_v6  ;;  %1105 = vmatpush3.msra.mxu1 %v423_v5  ;;  %s1208_s30 = scalar_lea.vmem %s1563_s21, 128  ;;  %s1214_s2 = scalar_lea.vmem %s1213_s1, 256 }
  0x24   : > { %1122 = vmatpush3.msra.mxu0 %v647_v6  ;;  %1107 = vmatmul.mubr.msk.f32.vlgmr.msra.gmra.mxu1 %vm425_vm0, %v422_v7  ;;  %p1209_p12 = scmp.ne.s32.totalorder %s1563_s21, %s1208_s30  ;;  %p1215_p1 = scmp.lt.s32.totalorder %s1563_s21, %s1213_s1 }
  0x25   : > { %1109 = vmatprep.subr.mxu1 %v522_v8  ;;  %1124 = vmatmul.mubr.msk.f32.vlgmr.msra.gmra.mxu0 %vm425_vm0, %v640_v9  ;;  %p1216_p2 = scmp.lt.s32.totalorder %s1214_s2, %s1208_s30 }
  0x26   : > { %1110 = vmatpush3.msra.mxu1 %v522_v8  ;;  %1113 = vmatprep.mubr.msk.f32.mxu1 %vm425_vm0, %v517_v11  ;;  %p1210_p13 = pnand %p1209_p12, %p1440_p4 }
  0x27   : > { %1111 = vmatprep.subr.mxu1 %v521_v10  ;;  %1126 = vmatprep.mubr.msk.f32.mxu0 %vm425_vm0, %v641_v12  ;;  %p1217_p3 = por %p1216_p2, %p1215_p1 }
  0x28   : > { %1112 = vmatpush3.msra.mxu1 %v521_v10  ;;  %p1211_p0 = pneg %p1210_p13 }
  0x29   : > { %1114 = vmatmul.mubr.msk.f32.vlgmr.msra.gmra.mxu1 %vm425_vm0, %v518_v13  ;;  %1127 = vmatmul.mubr.msk.f32.gmra.mxu0 %vm425_vm0, %v642_v14 }
  0x2a   : > { %1116 = vmatprep.mubr.msk.f32.mxu1 %vm425_vm0, %v519_v15  ;;  %1129 = vmatprep.mubr.msk.f32.mxu0 %vm425_vm0, %v643_v16  ;;  %p1218_p5 = pnand %p1217_p3, %p1211_p0 }
  0x2d   : > { %1117 = vmatmul.mubr.msk.f32.gmra.mxu1 %vm425_vm0, %v520_v17  ;;  %1130 = vmatmul.mubr.msk.f32.gmra.mxu0 %vm425_vm0, %v644_v18 }
  0x2e   : > { %1132 = vmatprep.mubr.msk.f32.mxu0 %vm425_vm0, %v645_v19 }
  0x31   : > { %1133 = vmatmul.mubr.msk.f32.gmra.mxu0 %vm425_vm0, %v646_v20 }
  0xe4   : > { %v1108_v21 = vpop.f32.mrf.mxu1 }
  0xe5   : > { %509 = vst.msk [vmem:[#allocation2 + $0x8] sm:$0xff] %vm507_vm1, %v1108_v21  ;;  %v1125_v22 = vpop.f32.mrf.mxu0 }
  0xe6   : > { %v498_v23 = vpop.f32.mrf.mxu1 }
  0xe7   : > { %508 = vst.msk [vmem:[#allocation2] sm:$0xff] %vm507_vm1, %v498_v23  ;;  %v739_v24 = vpop.f32.mrf.mxu0 }
  0xe9   : > { %v1115_v25 = vpop.f32.mrf.mxu1  ;;  %v1128_v26 = vpop.f32.mrf.mxu0 }
  0xeb   : > { %v601_v27 = vpop.f32.mrf.mxu1  ;;  %v749_v28 = vpop.f32.mrf.mxu0 }
  0xec   : > { %v512_v29 = vld [vmem:[#allocation2 + $0x8] sm:$0xff] }
  0xed   : > { %v1118_v30 = vpop.f32.mrf.mxu1  ;;  %621 = vst.msk [vmem:[#allocation2 + $0x8] sm:$0xff] %vm507_vm1, %v1115_v25  ;;  %v1131_v31 = vpop.f32.mrf.mxu0 }
  0xee   : > { %623 = vst.msk [vmem:[#allocation2 + $0x18] sm:$0xff] %vm507_vm1, %v1118_v30  ;;  %v1530_v32 = vld [vmem:[#allocation2] sm:$0xff]  ;;  %783 = vst.msk [vmem:[#allocation2 + $0x28] sm:$0xff] %vm507_vm1, %v1131_v31 }
  0xef   : > { %v611_v33 = vpop.f32.mrf.mxu1  ;;  %620 = vst.msk [vmem:[#allocation2] sm:$0xff] %vm507_vm1, %v601_v27  ;;  %v759_v34 = vpop.f32.mrf.mxu0 }
  0xf0   : > { %622 = vst.msk [vmem:[#allocation2 + $0x10] sm:$0xff] %vm507_vm1, %v611_v33  ;;  %782 = vst.msk [vmem:[#allocation2 + $0x20] sm:$0xff] %vm507_vm1, %v759_v34 }
  0xf1   : > { %v1134_v35 = vpop.f32.mrf.mxu0 }
  0xf2   : > { %785 = vst.msk [vmem:[#allocation2 + $0x38] sm:$0xff] %vm507_vm1, %v1134_v35 }
  0xf3   : > { %v769_v36 = vpop.f32.mrf.mxu0 }
  0xf4   : > { %v626_v38 = vld [vmem:[#allocation2 + $0x8] sm:$0xff]  ;;  %784 = vst.msk [vmem:[#allocation2 + $0x30] sm:$0xff] %vm507_vm1, %v769_v36 }
  0xf5   : > { %v634_v37 = vld [vmem:[#allocation2 + $0x18] sm:$0xff]  ;;  %v804_v39 = vld [vmem:[#allocation2 + $0x28] sm:$0xff]  ;;  %627 = vrot.lane.b32.xlu0 %v626_v38, %s1343_s22  ;;  %779 = vst.msk [vmem:[#allocation2 + $0x8] sm:$0xff] %vm507_vm1, %v1125_v22 }
  0xf6   : > { %781 = vst.msk [vmem:[#allocation2 + $0x18] sm:$0xff] %vm507_vm1, %v1128_v26  ;;  %805 = vrot.lane.b32.xlu1 %v804_v39, %s1344_s23  ;;  %v624_v41 = vld [vmem:[#allocation2] sm:$0xff] }
  0xf7   : > { %v630_v40 = vld [vmem:[#allocation2 + $0x10] sm:$0xff]  ;;  %v800_v42 = vld [vmem:[#allocation2 + $0x20] sm:$0xff]  ;;  %778 = vst.msk [vmem:[#allocation2] sm:$0xff] %vm507_vm1, %v739_v24 }
  0xf8   : > { %780 = vst.msk [vmem:[#allocation2 + $0x10] sm:$0xff] %vm507_vm1, %v749_v28 }
  0xf9   : > { %v812_v47 = vld [vmem:[#allocation2 + $0x38] sm:$0xff] }
  0xfa   : > { %801 = vrot.lane.b32.xlu1 %v800_v42, %s1345_s25  ;;  %s1679_s25 = scalar_lea.vmem [#allocation5], %s1543_s19 }
  0xfb   : > { %v808_v45 = vld [vmem:[#allocation2 + $0x30] sm:$0xff] }
  0xfc   : > { %v788_v43 = vld [vmem:[#allocation2 + $0x8] sm:$0xff] }
  0xfd   : > { %v796_v44 = vld [vmem:[#allocation2 + $0x18] sm:$0xff]  ;;  %789 = vrot.lane.b32.xlu0 %v788_v43, %s1343_s22 }
  0xfe   : > { %797 = vrot.lane.b32.xlu1 %v796_v44, %s1346_s26  ;;  %v786_v53 = vld [vmem:[#allocation2] sm:$0xff] }
  0xff   : > { %v792_v46 = vld [vmem:[#allocation2 + $0x10] sm:$0xff] }
 0x101   : > { %793 = vrot.lane.b32.xlu0 %v792_v46, %s1347_s24 }
 0x102   : > { %809 = vrot.lane.b32.xlu1 %v808_v45, %s1348_s14  ;;  %s1561_s14 = scalar_lea.hbm %s1674_s6, %s1546_s20 }
 0x105   : > { %631 = vrot.lane.b32.xlu0 %v630_v40, %s1347_s24  ;;  %s818_s24 = scalar_lea.sflag [#allocation4], %s372_s11 }
 0x106   : > { %513 = vrot.lane.b32.xlu1 %v512_v29, %s1343_s22  ;;  %s1690_s22 = sadd.s32 4294967295, %s1340_s10  }
 0x107   : > { %s1551_s23 = sand.u32 1, %s1690_s22  }
 0x109   : > { %635 = vrot.lane.b32.xlu0 %v634_v37, %s1346_s26  ;;  %s856_s26 = sshll.u32 %s1679_s25, 4  ;;  %s1569_s25 = scalar_lea.hbm %s1675_s7, %s1546_s20  ;;  %s1571_s26 = int_to_ptr.vmem [resolvable:$true] %s856_s26 }
 0x10d   : > { %813 = vrot.lane.b32.xlu0 %v812_v47, %s1349_s16 }
 0x167   : > { %v628_v49 = vpop.permute.xlu0 %627 }
 0x168   : > { %v806_v48 = vpop.permute.xlu1 %805  ;;  %v629_v60 = vadd.f32 %v628_v49, %v624_v41 }
 0x16c   : > { %v802_v50 = vpop.permute.xlu1 %801 }
 0x16f   : > { %v790_v51 = vpop.permute.xlu0 %789 }
 0x170   : > { %v798_v52 = vpop.permute.xlu1 %797  ;;  %v791_v54 = vadd.f32 %v790_v51, %v786_v53 }
 0x173   : > { %v794_v55 = vpop.permute.xlu0 %793 }
 0x174   : > { %v810_v56 = vpop.permute.xlu1 %809  ;;  %v795_v57 = vadd.f32 %v794_v55, %v791_v54 }
 0x176   : > { %v799_v58 = vadd.f32 %v798_v52, %v795_v57 }
 0x177   : > { %v632_v59 = vpop.permute.xlu0 %631 }
 0x178   : > { %v803_v61 = vadd.f32 %v802_v50, %v799_v58  ;;  %v514_v62 = vpop.permute.xlu1 %513  ;;  %v633_v0 = vadd.f32 %v632_v59, %v629_v60 }
 0x179   : > { %v515_v63 = vadd.f32 %v514_v62, %v1530_v32 }
 0x17a   : > { %v807_v1 = vadd.f32 %v806_v48, %v803_v61 }
 0x17b   : > { %516 = vst [vmem:[%s374_s12] sm:$0xff] %v515_v63  ;;  %v636_v2 = vpop.permute.xlu0 %635 }
 0x17c   : > { %v637_v3 = vadd.f32 %v636_v2, %v633_v0 }
 0x17d   : > { %1221 = shalt.err (!%p1218_p5)
}
 0x17e   : > { %s1222_s12 = scalar_lea.hbm %s1561_s14, 128  ;;  %s1226_s0 = scalar_lea.hbm %s1674_s6, 256 }
 0x17f   : > { %p1223_p6 = scmp.ne.s32.totalorder %s1561_s14, %s1222_s12  ;;  %p1227_p10 = scmp.lt.s32.totalorder %s1561_s14, %s1674_s6 }
 0x180   : > { %p1228_p11 = scmp.lt.s32.totalorder %s1226_s0, %s1222_s12 }
 0x181   : > { %p1224_p7 = pnand %p1223_p6, %p1440_p4 }
 0x182   : > { %p1229_p12 = por %p1228_p11, %p1227_p10 }
 0x183   : > { %p1225_p9 = pneg %p1224_p7 }
 0x185   : > { %p1230_p13 = pnand %p1229_p12, %p1225_p9 }
 0x187   : > { %1233 = shalt.err (!%p1230_p13)
}
 0x188   : > { %1135 = dma.vmem_to_hbm [thread:$0]  (%p1440_p4), %s1563_s21, 128, %s1561_s14, %s818_s24   ;;  %v811_v4 = vadd.f32 %v810_v56, %v807_v1  ;;  %v814_v5 = vpop.permute.xlu0 %813 }
 0x189   : > { %s388_s1 = scalar_lea.vmem [#allocation7], %s1543_s19  ;;  %s1691_s3 = scalar_lea.vmem [#allocation5], %s1543_s19 }
 0x18a   : > { %s1596_s2 = sshll.u32 %s388_s1, 4  ;;  %638 = vst [vmem:[%s1691_s3] sm:$0xff] %v637_v3  ;;  %s823_s30 = scalar_lea.sflag [#allocation6], %s1551_s23  ;;  %s871_s2 = int_to_ptr.vmem [resolvable:$true] %s1596_s2 }
 0x18b   : > { %s1234_s12 = scalar_lea.vmem %s1571_s26, 128  ;;  %s1351_s11 = smov [#allocation5]  }
 0x18c   : > { %p1235_p0 = scmp.ne.s32.totalorder %s1571_s26, %s1234_s12  ;;  %s1238_s16 = sshll.u32 %s1351_s11, 4  ;;  %s1239_s16 = int_to_ptr.vmem [resolvable:$false] %s1238_s16 }
 0x18d   : > { %s1240_s0 = scalar_lea.vmem %s1239_s16, 256  ;;  %p1241_p3 = scmp.lt.s32.totalorder %s1571_s26, %s1239_s16 }
 0x18e   : > { %p1236_p1 = pnand %p1235_p0, %p1440_p4  ;;  %p1242_p5 = scmp.lt.s32.totalorder %s1240_s0, %s1234_s12 }
 0x190   : > { %p1237_p2 = pneg %p1236_p1  ;;  %p1243_p6 = por %p1242_p5, %p1241_p3 }
 0x192   : > { %p1244_p7 = pnand %p1243_p6, %p1237_p2 }
 0x194   : > { %1247 = shalt.err (!%p1244_p7)
}
 0x195   : > { %s1248_s21 = scalar_lea.hbm %s1569_s25, 128  ;;  %s1252_s22 = scalar_lea.hbm %s1675_s7, 256 }
 0x196   : > { %p1249_p9 = scmp.ne.s32.totalorder %s1569_s25, %s1248_s21  ;;  %p1253_p12 = scmp.lt.s32.totalorder %s1569_s25, %s1675_s7 }
 0x197   : > { %p1254_p13 = scmp.lt.s32.totalorder %s1252_s22, %s1248_s21 }
 0x198   : > { %p1250_p10 = pnand %p1249_p9, %p1440_p4 }
 0x199   : > { %p1255_p0 = por %p1254_p13, %p1253_p12 }
 0x19a   : > { %p1251_p11 = pneg %p1250_p10 }
 0x19c   : > { %p1256_p1 = pnand %p1255_p0, %p1251_p11 }
 0x19e   : > { %1259 = shalt.err (!%p1256_p1)
}
 0x19f   : > { %1136 = dma.vmem_to_hbm [thread:$0]  (%p1440_p4), %s1571_s26, 128, %s1569_s25, %s823_s30   ;;  %v815_v6 = vadd.f32 %v814_v5, %v811_v4 }
 0x1a0   : > { %s868_s0 = scalar_lea.hbm %s1676_s8, %s1546_s20  ;;  %s1260_s21 = scalar_lea.vmem %s871_s2, 128 }
 0x1a1   : > { %816 = vst [vmem:[%s388_s1] sm:$0xff] %v815_v6  ;;  %p1261_p2 = scmp.ne.s32.totalorder %s871_s2, %s1260_s21  ;;  %s1352_s14 = smov [#allocation7]  }
 0x1a2   : > { %s1264_s24 = sshll.u32 %s1352_s14, 4  ;;  %s1265_s24 = int_to_ptr.vmem [resolvable:$false] %s1264_s24 }
 0x1a3   : > { %p1262_p3 = pnand %p1261_p2, %p1440_p4  ;;  %s1266_s22 = scalar_lea.vmem %s1265_s24, 256 }
 0x1a4   : > { %p1267_p6 = scmp.lt.s32.totalorder %s871_s2, %s1265_s24  ;;  %p1268_p7 = scmp.lt.s32.totalorder %s1266_s22, %s1260_s21 }
 0x1a5   : > { %p1263_p5 = pneg %p1262_p3 }
 0x1a6   : > { %p1269_p9 = por %p1268_p7, %p1267_p6 }
 0x1a8   : > { %p1270_p10 = pnand %p1269_p9, %p1263_p5 }
 0x1aa   : > { %1273 = shalt.err (!%p1270_p10)
}
 0x1ab   : > { %s1274_s25 = scalar_lea.hbm %s868_s0, 128  ;;  %s1278_s26 = scalar_lea.hbm %s1676_s8, 256 }
 0x1ac   : > { %p1275_p11 = scmp.ne.s32.totalorder %s868_s0, %s1274_s25  ;;  %p1279_p0 = scmp.lt.s32.totalorder %s868_s0, %s1676_s8 }
 0x1ad   : > { %p1280_p1 = scmp.lt.s32.totalorder %s1278_s26, %s1274_s25 }
 0x1ae   : > { %p1276_p12 = pnand %p1275_p11, %p1440_p4 }
 0x1af   : > { %p1281_p2 = por %p1280_p1, %p1279_p0 }
 0x1b0   : > { %p1277_p13 = pneg %p1276_p12 }
 0x1b2   : > { %p1282_p3 = pnand %p1281_p2, %p1277_p13 }
 0x1b4   : > { %1285 = shalt.err (!%p1282_p3)
}
 0x1b5   : > { %1137 = dma.vmem_to_hbm [thread:$0]  (%p1440_p4), %s871_s2, 128, %s868_s0, %s823_s30  }
 0x1b6 PF: > { %p1151_p5 = scmp.ge.s32.totalorder %s1340_s10, 2  ;;  %s882_s11 = sand.u32 1, %s1320_s27  }
 0x1b7   : > { %s883_s12 = scalar_lea.sflag [#allocation4], %s882_s11 }
 0x1b8   : > { %p1142_p6 = pnand %p1151_p5, %p1449_p8 }
 0x1ba   : > { %p1143_p7 = pneg %p1142_p6 }
 0x1bc   : > { %1311 = dma.done.wait (%p1143_p7), %s883_s12, 128  }
 0x1bd   : > { %1313 = vsyncadd (%p1143_p7), %s883_s12, 4294967168  ;;  %s1692_s16 = sadd.s32 4294967294, %s1340_s10  }
 0x1be   : > { %s891_s21 = sand.u32 1, %s1692_s16  }
 0x1bf   : > { %s892_s14 = scalar_lea.sflag [#allocation6], %s891_s21 }
 0x1c0   : > { %1315 = dma.done.wait (%p1143_p7), %s892_s14, 256  }
 0x1c1   : > { %1317 = vsyncadd (%p1143_p7), %s892_s14, 4294967040  ;;  %s25_s10 = sadd.s32 1, %s1340_s10   ;;  %s1693_s27 = smov %s1324_s28 }
 0x1c2   : > { %p22_p4 = scmp.ge.s32.totalorder %s25_s10, 4   ;;  %s1694_s28 = smov %s1328_s29 }
 0x1c3   : > { %s1695_s29 = smov %s1455_s18  ;;  %s1696_s30 = smov %s1336_s9 }
 0x1c4   : > { %s1697_s9 = smov %s1699_s13  ;;  %24 = sbr.rel (!%p22_p4) target bundleno = 11 (0xb), region = 117 }
 0x1c9   :  { %906 = vsyncpa [#allocation4], 1 }
 0x1ca   :  { %908 = vsyncpa [#allocation4 + $0x1], 1 }
 0x1cb   :  { %909 = vsyncpa [#allocation6], 1 }
 0x1cc   :  { %911 = vsyncpa [#allocation6 + $0x1], 1 }

</bundles_post_ra>
